<compile_context>
chip_gen: v6e
topology: v6e:2x2x1
jax: 0.10.0
libtpu: 0.0.40
codegen_flags: <defaults>
</compile_context>

<pallas_src>
import functools

import jax
import jax.numpy as jnp
from jax import lax
from jax.experimental import pallas as pl
from jax.experimental.pallas import tpu as pltpu

_EPS = 1e-6  # F.pairwise_distance default eps (added to the difference)
_MIB = 1024 * 1024


def _cdiv(a: int, b: int) -> int:
    return (a + b - 1) // b


def _round_up(x: int, m: int) -> int:
    return _cdiv(x, m) * m


def _vmem_budgets():
    """(double-buffered tile budget, vmem_limit_bytes) per TPU generation."""
    try:
        info = pltpu.get_tpu_info()
        cap = getattr(info, "vmem_capacity_bytes", 64 * _MIB)
    except Exception:
        cap = 64 * _MIB  # conservative default (v7x per-TensorCore VMEM)
    if cap >= 100 * _MIB:              # v5e / v6e: 128 MiB physical VMEM
        return 56 * _MIB, 96 * _MIB
    return 28 * _MIB, 48 * _MIB         # v7x: 64 MiB per TensorCore


def _choose_rows_per_tile(rows: int, lane_w: int, itemsize: int,
                          tile_budget: int) -> int:
    """Rows (second-minor dim) per grid step from a VMEM byte budget."""
    # Per step: 2 inputs x 2 pipeline buffers in the input dtype, plus roughly
    # 4 tile-sized f32 temporaries (diff, sq, hi/lo, matmul result).
    per_row = 4 * lane_w * itemsize + 4 * lane_w * 4
    tr = max(8, tile_budget // max(per_row, 1))
    tr = (tr // 8) * 8
    if rows < 8:
        return rows                      # block == full dim (single tiny tile)
    tr = min(tr, (rows // 8) * 8)        # never exceed the array extent
    # Prefer >= 2 tiles so the "parallel" grid axis can occupy both
    # TensorCores on v7x.
    half = _round_up(_cdiv(rows, 2), 8)
    tr = min(tr, max(8, half))
    return max(8, tr)


def _contrastive_loss_kernel(x1_ref, x2_ref, lab_ref, out_ref, *,
                             margin: float, feat_dim: int, samples_per_row: int,
                             valid_rows: int, rows_per_tile: int, ragged: bool):
    i = pl.program_id(0)

    x1 = x1_ref[...].astype(jnp.float32)      # (tr, L)
    x2 = x2_ref[...].astype(jnp.float32)      # (tr, L)
    lab = lab_ref[...].astype(jnp.float32)    # (tr, S)

    # F.pairwise_distance: ||x1 - x2 + eps||_2 along the feature dim.
    diff = x1 - x2 + _EPS
    sq = diff * diff                          # (tr, L)

    if samples_per_row == 1:
        # One sample per 128-lane row: plain lane reduction on the XLU.
        d2 = jnp.sum(sq, axis=-1, keepdims=True)                    # (tr, 1)
    else:
        # Lane-dense layout: each 128-lane row holds S samples of D features.
        # Per-sample sum-of-squares = sq @ block-diag(ones(D)), on the idle MXU.
        # hi/lo bf16 split keeps the result f32-accurate (residual ~1e-5 rel)
        # without relying on any particular MXU f32 precision policy.
        lanes = sq.shape[-1]                                          # 128
        k = lax.broadcasted_iota(jnp.int32, (lanes, lanes), 0)
        j = lax.broadcasted_iota(jnp.int32, (lanes, lanes), 1)
        seg = jnp.where(k // feat_dim == j, 1.0, 0.0).astype(jnp.bfloat16)
        hi = sq.astype(jnp.bfloat16)
        lo = (sq - hi.astype(jnp.float32)).astype(jnp.bfloat16)
        d2w = (jnp.dot(hi, seg, preferred_element_type=jnp.float32)
               + jnp.dot(lo, seg, preferred_element_type=jnp.float32))
        d2 = d2w[:, :samples_per_row]                                 # (tr, S)

    dist = jnp.sqrt(d2)
    hinge = jnp.maximum(margin - dist, 0.0)
    per_sample = (1.0 - lab) * d2 + lab * (hinge * hinge)             # (tr, S)

    def write(vals):
        # One partial per tile, at [0, 0] of a lane-dense (8, 128) output
        # block (iota+where keeps a known-good lowering; cost is negligible
        # since the kernel is DMA-bound).
        r = lax.broadcasted_iota(jnp.int32, (8, 128), 0)
        c = lax.broadcasted_iota(jnp.int32, (8, 128), 1)
        out_ref[...] = jnp.where((r == 0) & (c == 0), jnp.sum(vals), 0.0)

    if ragged:
        last = pl.num_programs(0) - 1

        @pl.when(i == last)
        def _():
            # Mask rows past the true batch (garbage read by the ragged
            # boundary block).  Select (not multiply) so NaN/Inf in garbage
            # rows cannot propagate; matmul rows are independent, so garbage
            # rows never contaminate valid ones.
            row = i * rows_per_tile + lax.broadcasted_iota(
                jnp.int32, per_sample.shape, 0)
            write(jnp.where(row < valid_rows, per_sample, 0.0))

        @pl.when(i != last)
        def _():
            write(per_sample)
    else:
        write(per_sample)


def contrastive_loss(output1, output2, label, margin=2.0):
    B, D = output1.shape
    assert output2.shape == (B, D)
    label_f = jnp.asarray(label).reshape(B).astype(jnp.float32)

    # Lane-dense repack for small feature dims: (B, D) -> (B*D/128, 128) is a
    # free, contiguous view; each 128-lane row then carries 128/D samples.
    s = 128 // D if (D < 128 and 128 % D == 0) else 1
    lane_dense = s > 1 and B % s == 0 and (B // s) >= 8
    if lane_dense:
        rows, lane_w = B // s, 128
        x1 = output1.reshape(rows, lane_w)
        x2 = output2.reshape(rows, lane_w)
        lab = label_f.reshape(rows, s)
    else:
        # TODO(synk): D that does not divide 128 (or tiny / non-multiple B)
        # falls back to the (B, D) layout; lanes past D are simply unused.
        s, rows, lane_w = 1, B, D
        x1, x2, lab = output1, output2, label_f.reshape(B, 1)

    tile_budget, vmem_limit = _vmem_budgets()
    tr = _choose_rows_per_tile(rows, lane_w,
                               jnp.dtype(output1.dtype).itemsize, tile_budget)
    num_tiles = _cdiv(rows, tr)
    ragged = (rows % tr) != 0

    kernel = functools.partial(
        _contrastive_loss_kernel, margin=float(margin), feat_dim=D,
        samples_per_row=s, valid_rows=rows, rows_per_tile=tr, ragged=ragged)

    partials = pl.pallas_call(
        kernel,
        out_shape=jax.ShapeDtypeStruct((num_tiles * 8, 128), jnp.float32),
        grid=(num_tiles,),
        in_specs=[
            pl.BlockSpec((tr, lane_w), lambda i: (i, 0)),
            pl.BlockSpec((tr, lane_w), lambda i: (i, 0)),
            pl.BlockSpec((tr, s), lambda i: (i, 0)),
        ],
        out_specs=pl.BlockSpec((8, 128), lambda i: (i, 0)),
        compiler_params=pltpu.CompilerParams(
            dimension_semantics=("parallel",),
            vmem_limit_bytes=vmem_limit,
        ),
    )(x1, x2, lab)

    return jnp.sum(partials) / B


def contrastive_loss_ref(output1, output2, label, margin=2.0):
    # Pure-JAX reference for sanity checking.
    diff = output1.astype(jnp.float32) - output2.astype(jnp.float32) + _EPS
    dist = jnp.sqrt(jnp.sum(diff * diff, axis=-1))
    lab = label.astype(jnp.float32)
    per = (1.0 - lab) * dist**2 + lab * jnp.clip(margin - dist, 0.0) ** 2
    return jnp.mean(per)


if __name__ == "__main__":
    key = jax.random.PRNGKey(0)
    ks = jax.random.split(key, 12)

    # 1) Small case (module-scale): exercises the (B, D) fallback path.
    B, D = 8, 32
    o1 = jax.random.normal(ks[0], (B, D), dtype=jnp.float32)
    o2 = jax.random.normal(ks[1], (B, D), dtype=jnp.float32)
    lab = jax.random.bernoulli(ks[2], p=0.5, shape=(B,)).astype(jnp.float32)
    got = jax.block_until_ready(contrastive_loss(o1, o2, lab))
    ref = contrastive_loss_ref(o1, o2, lab)
    assert jnp.allclose(got, ref, rtol=1e-4, atol=1e-5), (got, ref)

    # 2) Larger case: lane-dense path, multiple tiles, ragged last tile.
    B2, D2 = 2500, 32
    p1 = jax.random.normal(ks[3], (B2, D2), dtype=jnp.float32)
    p2 = jax.random.normal(ks[4], (B2, D2), dtype=jnp.float32)
    lab2 = jax.random.bernoulli(ks[5], p=0.5, shape=(B2,)).astype(jnp.float32)
    got2 = jax.block_until_ready(contrastive_loss(p1, p2, lab2))
    ref2 = contrastive_loss_ref(p1, p2, lab2)
    assert jnp.allclose(got2, ref2, rtol=1e-4, atol=1e-5), (got2, ref2)

    # 3) Lane-dense path, exact tiling (no ragged tile), D=64.
    B3, D3 = 256, 64
    q1 = jax.random.normal(ks[6], (B3, D3), dtype=jnp.float32)
    q2 = jax.random.normal(ks[7], (B3, D3), dtype=jnp.float32)
    lab3 = jax.random.bernoulli(ks[8], p=0.5, shape=(B3,)).astype(jnp.float32)
    got3 = jax.block_until_ready(contrastive_loss(q1, q2, lab3))
    ref3 = contrastive_loss_ref(q1, q2, lab3)
    assert jnp.allclose(got3, ref3, rtol=1e-4, atol=1e-5), (got3, ref3)

    # 4) Fallback path with D not dividing 128 and a ragged batch.
    B4, D4 = 19, 160
    r1 = jax.random.normal(ks[9], (B4, D4), dtype=jnp.float32)
    r2 = jax.random.normal(ks[10], (B4, D4), dtype=jnp.float32)
    lab4 = jax.random.bernoulli(ks[11], p=0.5, shape=(B4,)).astype(jnp.float32)
    got4 = jax.block_until_ready(contrastive_loss(r1, r2, lab4))
    ref4 = contrastive_loss_ref(r1, r2, lab4)
    assert jnp.allclose(got4, ref4, rtol=1e-4, atol=1e-5), (got4, ref4)

    print("KERNEL_OK")
</pallas_src>

<mosaic_0001>
module attributes {stable_mosaic.version = 11 : i64} {
  func.func @_contrastive_loss_kernel(%arg0: i32, %arg1: memref<8x32xf32, #tpu.memory_space<vmem>>, %arg2: memref<8x32xf32, #tpu.memory_space<vmem>>, %arg3: memref<8x1xf32, #tpu.memory_space<vmem>>, %arg4: memref<8x128xf32, #tpu.memory_space<vmem>>) attributes {dimension_semantics = [#tpu.dimension_semantics<parallel>], iteration_bounds = array<i64: 1>, scalar_prefetch = 0 : i64, scratch_operands = 0 : i64, tpu.core_type = #tpu.core_type<tc>, window_params = [{transform_indices = @transform_0, window_bounds = array<i64: 8, 32>}, {transform_indices = @transform_1, window_bounds = array<i64: 8, 32>}, {transform_indices = @transform_2, window_bounds = array<i64: 8, 1>}, {transform_indices = @transform_3, window_bounds = array<i64: 8, 128>}]} {
    %c0 = arith.constant 0 : index
    %c0_0 = arith.constant 0 : index
    %0 = vector.load %arg1[%c0, %c0_0] : memref<8x32xf32, #tpu.memory_space<vmem>>, vector<8x32xf32>
    %c0_1 = arith.constant 0 : index
    %c0_2 = arith.constant 0 : index
    %1 = vector.load %arg2[%c0_1, %c0_2] : memref<8x32xf32, #tpu.memory_space<vmem>>, vector<8x32xf32>
    %c0_3 = arith.constant 0 : index
    %c0_4 = arith.constant 0 : index
    %2 = vector.load %arg3[%c0_3, %c0_4] : memref<8x1xf32, #tpu.memory_space<vmem>>, vector<8x1xf32>
    %3 = arith.subf %0, %1 : vector<8x32xf32>
    %cst = arith.constant 9.99999997E-7 : f32
    %4 = vector.broadcast %cst : f32 to vector<8x32xf32>
    %5 = arith.addf %3, %4 : vector<8x32xf32>
    %6 = arith.mulf %5, %5 : vector<8x32xf32>
    %cst_5 = arith.constant dense<0.000000e+00> : vector<8xf32>
    %7 = vector.multi_reduction <add>, %6, %cst_5 [1] : vector<8x32xf32> to vector<8xf32>
    %8 = vector.shape_cast %7 : vector<8xf32> to vector<8x1xf32>
    %9 = math.sqrt %8 : vector<8x1xf32>
    %cst_6 = arith.constant 2.000000e+00 : f32
    %10 = vector.broadcast %cst_6 : f32 to vector<8x1xf32>
    %11 = arith.subf %10, %9 : vector<8x1xf32>
    %cst_7 = arith.constant 0.000000e+00 : f32
    %12 = vector.broadcast %cst_7 : f32 to vector<8x1xf32>
    %13 = arith.maximumf %11, %12 : vector<8x1xf32>
    %cst_8 = arith.constant 1.000000e+00 : f32
    %14 = vector.broadcast %cst_8 : f32 to vector<8x1xf32>
    %15 = arith.subf %14, %2 : vector<8x1xf32>
    %16 = arith.mulf %15, %8 : vector<8x1xf32>
    %17 = arith.mulf %13, %13 : vector<8x1xf32>
    %18 = arith.mulf %2, %17 : vector<8x1xf32>
    %19 = arith.addf %16, %18 : vector<8x1xf32>
    %20 = tpu.iota {dimensions = array<i32: 0>} : vector<8x128xi32>
    %21 = tpu.iota {dimensions = array<i32: 1>} : vector<8x128xi32>
    %c0_i32 = arith.constant 0 : i32
    %22 = vector.broadcast %c0_i32 : i32 to vector<8x128xi32>
    %23 = arith.cmpi eq, %20, %22 : vector<8x128xi32>
    %c0_i32_9 = arith.constant 0 : i32
    %24 = vector.broadcast %c0_i32_9 : i32 to vector<8x128xi32>
    %25 = arith.cmpi eq, %21, %24 : vector<8x128xi32>
    %26 = arith.andi %23, %25 : vector<8x128xi1>
    %27 = vector.shape_cast %19 : vector<8x1xf32> to vector<1x8x1xf32>
    %cst_10 = arith.constant dense<0.000000e+00> : vector<1xf32>
    %28 = vector.multi_reduction <add>, %27, %cst_10 [1, 2] : vector<1x8x1xf32> to vector<1xf32>
    %29 = vector.shape_cast %28 : vector<1xf32> to vector<1x1x1xf32>
    %30 = vector.extract %29[0, 0, 0] : f32 from vector<1x1x1xf32>
    %cst_11 = arith.constant 0.000000e+00 : f32
    %31 = vector.broadcast %30 : f32 to vector<8x128xf32>
    %32 = vector.broadcast %cst_11 : f32 to vector<8x128xf32>
    %33 = arith.select %26, %31, %32 : vector<8x128xi1>, vector<8x128xf32>
    %c0_12 = arith.constant 0 : index
    %c0_13 = arith.constant 0 : index
    %34 = vector.load %arg4[%c0_12, %c0_13] : memref<8x128xf32, #tpu.memory_space<vmem>>, vector<8x128xf32>
    tpu.vector_store %arg4[%c0_12, %c0_13], %33 {strides = array<i32>} : memref<8x128xf32, #tpu.memory_space<vmem>>, vector<8x128xf32>,
    return
  }
  func.func @transform_0(%arg0: i32) -> (i32, i32) {
    %c0_i32 = arith.constant 0 : i32
    %c0_i32_0 = arith.constant 0 : i32
    return %arg0, %c0_i32 : i32, i32
  }
  func.func @transform_1(%arg0: i32) -> (i32, i32) {
    %c0_i32 = arith.constant 0 : i32
    %c0_i32_0 = arith.constant 0 : i32
    return %arg0, %c0_i32 : i32, i32
  }
  func.func @transform_2(%arg0: i32) -> (i32, i32) {
    %c0_i32 = arith.constant 0 : i32
    %c0_i32_0 = arith.constant 0 : i32
    return %arg0, %c0_i32 : i32, i32
  }
  func.func @transform_3(%arg0: i32) -> (i32, i32) {
    %c0_i32 = arith.constant 0 : i32
    %c0_i32_0 = arith.constant 0 : i32
    return %arg0, %c0_i32 : i32, i32
  }
}

</mosaic_0001>

<bundles_post_ra>
// kernel: tpu_custom_call.1
= control target key start
LH: loop header
LB: loop body
LE: loop exit
PB: predicated region body
PF: predicated region fallthrough
CT: control target
= control target key end

     0   :  { %8 = vsyncpa [#allocation3], 0  ;;  %s171_s0 = inlined_call_operand.vmem [shape: f32[8,32], index: 0, kind: input, shape index: {}]   ;;  %s172_s1 = inlined_call_operand.hbm [shape: f32[8,32], index: 1, kind: input, shape index: {}]   ;;  %s173_s2 = inlined_call_operand.vmem [shape: f32[8,1], index: 2, kind: input, shape index: {}]   ;;  %s174_s3 = inlined_call_operand.hbm [shape: f32[8,128], index: 3, kind: output, shape index: {}]  }
   0x1   :  { %9 = vsyncpa [#allocation4], 0  ;;  %s137_s12 = smov [#allocation2]  }
   0x2   :  { %s18_s13 = sshll.u32 %s137_s12, 4  ;;  %s19_s13 = int_to_ptr.vmem [resolvable:$true] %s18_s13 }
   0x3   :  { %s101_s14 = scalar_lea.vmem %s19_s13, 128  ;;  %p106_p1 = scmp.lt.s32.totalorder %s19_s13, %s19_s13 }
   0x4   :  { %p102_p0 = scmp.ne.s32.totalorder %s19_s13, %s101_s14  ;;  %p107_p2 = scmp.lt.s32.totalorder %s101_s14, %s101_s14 }
   0x6   :  { %p108_p3 = por %p107_p2, %p106_p1 }
   0x8   :  { %p109_p4 = pnand %p108_p3, %p102_p0 }
   0xa   :  { %112 = shalt.err (!%p109_p4)
}
   0xb   :  { %21 = dma.hbm_to_vmem [thread:$0]  %s172_s1, 128, %s19_s13, [#allocation3]  }
   0xc   :  { %133 = dma.done.wait [#allocation3], 128  }
   0xd   :  { %134 = vsyncadd [#allocation3], 4294967168  ;;  %v27_v0 = vld [vmem:[%s171_s0] sm:$0xff]  ;;  %vm33_vm0 = vcmask 261120   ;;  %vm58_vm3 = vcmask 7168   ;;  %v51_v28 = vlaneseq  ;;  %s138_s0 = smov [#allocation5]  }
   0xe   :  { %v28_v1 = vld [vmem:[#allocation2] sm:$0xff] }
   0xf   :  { %v30_v2 = vsub.f32 %v27_v0, %v28_v1  ;;  %v29_v11 = vld [vmem:[%s173_s2] sm:$0xff]  ;;  %v52_v29 = vshrl.u32 %v51_v28, 7  ;;  %v54_v30 = vand.u32 127, %v51_v28  ;;  %s78_s2 = sshll.u32 %s138_s0, 4  ;;  %s79_s2 = int_to_ptr.vmem [resolvable:$true] %s78_s2 }
  0x10   :  { %v46_v15 = vsub.f32 1.0, %v29_v11  ;;  %s113_s21 = scalar_lea.vmem %s79_s2, 128  ;;  %p118_p6 = scmp.lt.s32.totalorder %s79_s2, %s79_s2 }
  0x11   :  { %v31_v3 = vadd.f32 1e-06, %v30_v2  ;;  %vm55_vm4 = vcmp.eq.s32.totalorder %v52_v29, 0  ;;  %vm56_vm5 = vcmp.eq.s32.totalorder %v54_v30, 0  ;;  %p114_p5 = scmp.ne.s32.totalorder %s79_s2, %s113_s21  ;;  %p119_p7 = scmp.lt.s32.totalorder %s113_s21, %s113_s21 }
  0x12   :  { %vm57_vm6 = vmand %vm55_vm4, %vm56_vm5 }
  0x13   :  { %v32_v4 = vmul.f32 %v31_v3, %v31_v3  ;;  %p120_p8 = por %p119_p7, %p118_p6 }
  0x15   :  { %v34_v5 = vsel %vm33_vm0, %v32_v4, 0.0  ;;  %p121_p9 = pnand %p120_p8, %p114_p5 }
  0x16   :  { %35 = vadd.xlane.f32.xlu0 %v34_v5 }
  0x9f   :  { %v36_v6 = vpop.xlane.xlu0 %35 }
  0xa0   :  { %91 = vrsqrt.f32 %v36_v6  ;;  %vm39_vm1 = vcmp.eq.f32.partialorder %v36_v6, inf  ;;  %v42_v9 = vand.u32 2147483648, %v36_v6  ;;  %vm41_vm2 = vcmp.eq.f32.partialorder %v36_v6, 0.0 }
  0xa1   :  { %v47_v17 = vmul.f32 %v46_v15, %v36_v6 }
  0xad   :  { %v92_v7 = vpop.eup %91 }
  0xae   :  { %v38_v8 = vmul.f32 %v92_v7, %v36_v6 }
  0xb0   :  { %v40_v10 = vsel %vm39_vm1, %v36_v6, %v38_v8 }
  0xb1   :  { %v43_v12 = vsel %vm41_vm2, %v42_v9, %v40_v10 }
  0xb2   :  { %v44_v13 = vsub.f32 2.0, %v43_v12 }
  0xb4   :  { %v45_v14 = vmax.f32 %v44_v13, 0.0 }
  0xb6   :  { %v48_v16 = vmul.f32 %v45_v14, %v45_v14 }
  0xb8   :  { %v49_v18 = vmul.f32 %v48_v16, %v29_v11 }
  0xba   :  { %v50_v19 = vadd.f32 %v49_v18, %v47_v17 }
  0xbc   :  { %v59_v20 = vsel %vm58_vm3, %v50_v19, 0.0 }
  0xbd   :  { %60 = vadd.xlane.f32.xlu0 %v59_v20 }
 0x146   :  { %v61_v21 = vpop.xlane.xlu0 %60 }
 0x147   :  { %v62_v22 = vrot.slane %v61_v21, 4 }
 0x149   :  { %v63_v23 = vadd.f32 %v62_v22, %v61_v21 }
 0x14b   :  { %v64_v24 = vrot.slane %v63_v23, 2 }
 0x14d   :  { %v65_v25 = vadd.f32 %v64_v24, %v63_v23 }
 0x14f   :  { %v66_v26 = vrot.slane %v65_v25, 1 }
 0x151   :  { %v67_v27 = vadd.f32 %v66_v26, %v65_v25 }
 0x153   :  { %87 = vpush %v67_v27 }
 0x184   :  { %s88_s20 = spop %87 }
 0x185   :  { %v69_v31 = vstv %s88_s20 }
 0x186   :  { %v70_v32 = vsel %vm57_vm6, %v69_v31, 0.0 }
 0x187   :  { %71 = vst [vmem:[#allocation5] sm:$0xff] %v70_v32 }
 0x188   :  { %124 = shalt.err (!%p121_p9)
}
 0x189   :  { %81 = dma.vmem_to_hbm [thread:$0]  %s79_s2, 128, %s174_s3, [#allocation4]  }
 0x18a   :  { %135 = dma.done.wait [#allocation4], 128  }
 0x18b   :  { %136 = vsyncadd [#allocation4], 4294967168 }
 0x18c   :  { %85 = vsyncpa [#allocation3], 1 }
 0x18d   :  { %86 = vsyncpa [#allocation4], 1 }

</bundles_post_ra>
